<compile_context>
chip_gen: v6e
topology: v6e:2x2x1
jax: 0.10.0
libtpu: 0.0.40
codegen_flags: <defaults>
</compile_context>

<pallas_src>
import functools

import jax
import jax.numpy as jnp
from jax.experimental import pallas as pl
from jax.experimental.pallas import tpu as pltpu


def _adaptive_loss_kernel(w_ref, preds_ref, tgt_ref,
                          ce_out, w_out, inter_out, union_out,
                          ce_acc, w_acc, inter_acc, union_acc,
                          *, weighted):
    s = pl.program_id(2)
    n_s = pl.num_programs(2)

    # Reset per-(batch, chunk) accumulators at the start of each spatial sweep.
    @pl.when(s == 0)
    def _init():
        ce_acc[...] = jnp.zeros_like(ce_acc)
        inter_acc[...] = jnp.zeros_like(inter_acc)
        union_acc[...] = jnp.zeros_like(union_acc)
        if weighted:
            w_acc[...] = jnp.zeros_like(w_acc)

    logits = preds_ref[0].astype(jnp.float32)        # (C, TS)
    tgt = tgt_ref[0].astype(jnp.int32)               # (1, TS)
    C, TS = logits.shape

    cls_ids = jax.lax.broadcasted_iota(jnp.int32, (C, TS), 0)
    oh = cls_ids == tgt                              # bool mask (C, TS)

    # Numerically stable softmax pieces; divide / log stay on (1, TS) rows.
    m = jnp.max(logits, axis=0, keepdims=True)       # (1, TS)
    shifted = logits - m                             # (C, TS)
    e = jnp.exp(shifted)                             # (C, TS)  only big EUP op
    denom = jnp.sum(e, axis=0, keepdims=True)        # (1, TS)
    inv_denom = pl.reciprocal(denom)                 # exact; (1, TS) only
    log_denom = jnp.log(denom)                       # (1, TS)

    # Cross-entropy: nll = log(sum exp) - logit[target]
    picked = jnp.sum(jnp.where(oh, shifted, 0.0), axis=0, keepdims=True)
    nll = log_denom - picked                         # (1, TS)

    if weighted:
        w = w_ref[...].astype(jnp.float32)           # (C, 1)
        w_pix = jnp.sum(jnp.where(oh, w, 0.0), axis=0, keepdims=True)
        ce_acc[...] += w_pix * nll
        w_acc[...] += w_pix
    else:
        ce_acc[...] += nll                           # padded lanes fixed in wrapper

    # Soft-dice partials: reduce across lanes per tile (XLU slot), keep only
    # (C, 1) accumulators so the store slot isn't saturated by big RMWs.
    probs = e * inv_denom                            # (C, TS)
    inter_acc[...] += jnp.sum(jnp.where(oh, probs, 0.0), axis=1, keepdims=True)
    union_acc[...] += jnp.sum(jnp.where(oh, probs + 1.0, probs),
                              axis=1, keepdims=True)

    @pl.when(s == n_s - 1)
    def _final():
        ce_out[0, 0] = jnp.sum(ce_acc[...], axis=1, keepdims=True)   # (1, 1)
        inter_out[0, 0] = inter_acc[...]                             # (C, 1)
        union_out[0, 0] = union_acc[...]                             # (C, 1)
        if weighted:
            w_out[0, 0] = jnp.sum(w_acc[...], axis=1, keepdims=True)
        else:
            w_out[0, 0] = jnp.zeros((1, 1), jnp.float32)             # unused


def _pick_spatial_tile(S, C, logit_itemsize, tgt_itemsize):
    """Largest multiple-of-128 spatial tile within a conservative VMEM budget.

    Counts the double-buffered input streams, ~8 live f32 (C,TS)/(1,TS)
    temporaries Mosaic materializes, and the lane-wide accumulators.  Total
    budget ~20 MiB keeps headroom under the 32 MiB vmem_limit (v7x scoped
    default; v7x physical is 64 MiB, v5e/v6e 128 MiB)."""
    logits_budget = 4 << 20
    total_budget = 20 << 20
    per_lane = (2 * (C * logit_itemsize + tgt_itemsize)   # double-buffered inputs
                + 8 * C * 4 + 8 * 4                       # live f32 temporaries
                + 2 * 4)                                  # lane-wide CE/weight accs
    ts = min(logits_budget // max(1, C * logit_itemsize),
             total_budget // per_lane)
    ts = max(128, (ts // 128) * 128)
    s_ceil = -(-S // 128) * 128            # never (much) bigger than the data
    return min(ts, s_ceil)


def adaptive_loss(preds, targets, class_weights=None, *, spatial_tile=None):
    """preds: (B, C, H, W) float; targets: (B, H, W) int. Returns scalar loss."""
    B, C, H, W = preds.shape
    S = H * W
    weighted = class_weights is not None

    # Shrink the target stream (helps v5e most); int8 is valid for C <= 127.
    tgt_dtype = jnp.int8 if C <= 127 else jnp.int32

    if spatial_tile is None:
        TS = _pick_spatial_tile(S, C, preds.dtype.itemsize,
                                jnp.dtype(tgt_dtype).itemsize)
    else:
        TS = int(spatial_tile)
        assert TS % 128 == 0, "spatial_tile must be a multiple of 128"

    S_pad = -(-S // TS) * TS
    pad = S_pad - S

    preds_r = preds.reshape(B, C, S)                  # keep original dtype in HBM
    tgt_r = targets.astype(jnp.int32).reshape(B, S)
    if pad:
        # Zero logits => uniform softmax on padded pixels; out-of-range class
        # id => all-False one-hot.  Both are corrected analytically below.
        preds_r = jnp.pad(preds_r, ((0, 0), (0, 0), (0, pad)))
        tgt_r = jnp.pad(tgt_r, ((0, 0), (0, pad)), constant_values=C)
    tgt_r = tgt_r.astype(tgt_dtype).reshape(B, 1, S_pad)

    if weighted:
        w = class_weights.astype(jnp.float32).reshape(C, 1)
    else:
        w = jnp.ones((C, 1), jnp.float32)             # placeholder, unused

    num_s = S_pad // TS
    # 2-way spatial chunking on a second "parallel" axis: keeps both v7x
    # TensorCores busy at B == 1; harmless on single-core v5e/v6e.
    SC = 2 if (num_s % 2 == 0 and num_s >= 2) else 1
    num_s_pc = num_s // SC

    kernel = functools.partial(_adaptive_loss_kernel, weighted=weighted)

    ce_sum, w_sum, inter_p, union_p = pl.pallas_call(
        kernel,
        out_shape=(
            jax.ShapeDtypeStruct((B, SC, 1, 1), jnp.float32),   # CE partial sum
            jax.ShapeDtypeStruct((B, SC, 1, 1), jnp.float32),   # weight partial sum
            jax.ShapeDtypeStruct((B, SC, C, 1), jnp.float32),   # dice intersection
            jax.ShapeDtypeStruct((B, SC, C, 1), jnp.float32),   # dice union
        ),
        grid_spec=pltpu.PrefetchScalarGridSpec(
            num_scalar_prefetch=0,
            grid=(B, SC, num_s_pc),
            in_specs=[
                pl.BlockSpec((C, 1), lambda b, c, s: (0, 0)),            # weights
                pl.BlockSpec((1, C, TS),
                             lambda b, c, s: (b, 0, c * num_s_pc + s)),  # logits
                pl.BlockSpec((1, 1, TS),
                             lambda b, c, s: (b, 0, c * num_s_pc + s)),  # targets
            ],
            out_specs=[
                pl.BlockSpec((1, 1, 1, 1), lambda b, c, s: (b, c, 0, 0)),
                pl.BlockSpec((1, 1, 1, 1), lambda b, c, s: (b, c, 0, 0)),
                pl.BlockSpec((1, 1, C, 1), lambda b, c, s: (b, c, 0, 0)),
                pl.BlockSpec((1, 1, C, 1), lambda b, c, s: (b, c, 0, 0)),
            ],
            scratch_shapes=[
                pltpu.VMEM((1, TS), jnp.float32),   # CE lane-wide partials
                pltpu.VMEM((1, TS), jnp.float32),   # weight lane-wide partials
                pltpu.VMEM((C, 1), jnp.float32),    # dice intersection partials
                pltpu.VMEM((C, 1), jnp.float32),    # dice union partials
            ],
        ),
        compiler_params=pltpu.CompilerParams(
            dimension_semantics=("parallel", "parallel", "arbitrary"),
            vmem_limit_bytes=32 * 1024 * 1024,
        ),
    )(w, preds_r, tgt_r)

    smooth = 1e-6
    ce_num = jnp.sum(ce_sum)
    inter = jnp.sum(inter_p, axis=(1, 3))            # (B, C)
    union = jnp.sum(union_p, axis=(1, 3))            # (B, C)

    if pad:
        # Analytic correction for the zero-logit padded pixels: softmax is
        # uniform there (adds 1/C to every class's union) and, in the
        # unweighted CE, each adds log(C) to the numerator.  The one-hot mask
        # is all-False on padded pixels, so intersection / weighted CE /
        # weight sums need no correction.
        union = union - pad / C
        if not weighted:
            ce_num = ce_num - B * pad * jnp.log(jnp.float32(C))

    if weighted:
        ce = ce_num / jnp.sum(w_sum)
    else:
        ce = ce_num / float(B * S)

    dice = 1.0 - (2.0 * inter + smooth) / (union + smooth)
    return ce + jnp.mean(dice)


def _reference_loss(preds, targets, class_weights=None):
    """Plain-JAX reference matching the PyTorch forward."""
    B, C, H, W = preds.shape
    logp = jax.nn.log_softmax(preds, axis=1)
    oh = jax.nn.one_hot(targets, C, axis=1, dtype=jnp.float32)      # (B, C, H, W)
    nll = -jnp.sum(oh * logp, axis=1)                               # (B, H, W)
    if class_weights is None:
        ce = jnp.mean(nll)
    else:
        w_pix = class_weights[targets]                              # (B, H, W)
        ce = jnp.sum(w_pix * nll) / jnp.sum(w_pix)
    smooth = 1e-6
    p = jax.nn.softmax(preds, axis=1)
    inter = jnp.sum(p * oh, axis=(2, 3))
    union = jnp.sum(p, axis=(2, 3)) + jnp.sum(oh, axis=(2, 3))
    dice = 1.0 - (2.0 * inter + smooth) / (union + smooth)
    return ce + jnp.mean(dice)


if __name__ == "__main__":
    key = jax.random.PRNGKey(0)
    k1, k2, k3, k4 = jax.random.split(key, 4)

    # 1) Base case: B=2, C=4, 16x16, unweighted.
    B, C, H, W = 2, 4, 16, 16
    preds = jax.random.normal(k1, (B, C, H, W), jnp.float32)
    targets = jax.random.randint(k2, (B, H, W), 0, C, jnp.int32)
    loss = jax.block_until_ready(adaptive_loss(preds, targets))
    ref = _reference_loss(preds, targets)
    assert jnp.allclose(loss, ref, rtol=1e-5, atol=1e-5), (loss, ref)

    # 2) Weighted class path (validated per review's correctness concern).
    cw = jnp.array([0.5, 2.0, 1.0, 1.5], jnp.float32)
    loss_w = jax.block_until_ready(adaptive_loss(preds, targets, cw))
    ref_w = _reference_loss(preds, targets, cw)
    assert jnp.allclose(loss_w, ref_w, rtol=1e-5, atol=1e-5), (loss_w, ref_w)

    # 3) Non-multiple-of-128 spatial size with a forced small tile: exercises
    #    padding correction, multi-step accumulation and 2-way chunking.
    B2, C2, H2, W2 = 2, 5, 20, 20
    preds2 = jax.random.normal(k3, (B2, C2, H2, W2), jnp.float32)
    targets2 = jax.random.randint(k4, (B2, H2, W2), 0, C2, jnp.int32)
    loss2 = jax.block_until_ready(
        adaptive_loss(preds2, targets2, spatial_tile=128))
    ref2 = _reference_loss(preds2, targets2)
    assert jnp.allclose(loss2, ref2, rtol=1e-5, atol=1e-5), (loss2, ref2)

    print("KERNEL_OK")
</pallas_src>

<mosaic_0001>
module attributes {stable_mosaic.version = 11 : i64} {
  func.func @_adaptive_loss_kernel(%arg0: i32, %arg1: i32, %arg2: i32, %arg3: memref<4x1xf32, #tpu.memory_space<vmem>>, %arg4: memref<1x4x256xf32, #tpu.memory_space<vmem>>, %arg5: memref<1x1x256xi8, #tpu.memory_space<vmem>>, %arg6: memref<1x1x1x1xf32, #tpu.memory_space<vmem>>, %arg7: memref<1x1x1x1xf32, #tpu.memory_space<vmem>>, %arg8: memref<1x1x4x1xf32, #tpu.memory_space<vmem>>, %arg9: memref<1x1x4x1xf32, #tpu.memory_space<vmem>>, %arg10: memref<1x256xf32, #tpu.memory_space<vmem>>, %arg11: memref<1x256xf32, #tpu.memory_space<vmem>>, %arg12: memref<4x1xf32, #tpu.memory_space<vmem>>, %arg13: memref<4x1xf32, #tpu.memory_space<vmem>>) attributes {dimension_semantics = [#tpu.dimension_semantics<parallel>, #tpu.dimension_semantics<parallel>, #tpu.dimension_semantics<arbitrary>], iteration_bounds = array<i64: 2, 1, 1>, scalar_prefetch = 0 : i64, scratch_operands = 4 : i64, tpu.core_type = #tpu.core_type<tc>, window_params = [{pipeline_mode = #tpu.pipeline_mode<synchronous>, transform_indices = @transform_0, window_bounds = array<i64: 4, 1>}, {transform_indices = @transform_1, window_bounds = array<i64: 1, 4, 256>}, {transform_indices = @transform_2, window_bounds = array<i64: 1, 1, 256>}, {transform_indices = @transform_3, window_bounds = array<i64: 1, 1, 1, 1>}, {transform_indices = @transform_4, window_bounds = array<i64: 1, 1, 1, 1>}, {transform_indices = @transform_5, window_bounds = array<i64: 1, 1, 4, 1>}, {transform_indices = @transform_6, window_bounds = array<i64: 1, 1, 4, 1>}]} {
    %c0_i32 = arith.constant 0 : i32
    %0 = arith.cmpi eq, %arg2, %c0_i32 : i32
    %1 = arith.extui %0 : i1 to i32
    %c0_i32_0 = arith.constant 0 : i32
    %2 = arith.cmpi ne, %1, %c0_i32_0 : i32
    scf.if %2 {
      %cst_27 = arith.constant 0.000000e+00 : f32
      %48 = vector.broadcast %cst_27 : f32 to vector<1x256xf32>
      %c0_28 = arith.constant 0 : index
      %c0_29 = arith.constant 0 : index
      %49 = vector.load %arg10[%c0_28, %c0_29] : memref<1x256xf32, #tpu.memory_space<vmem>>, vector<1x256xf32>
      tpu.vector_store %arg10[%c0_28, %c0_29], %48 {strides = array<i32>} : memref<1x256xf32, #tpu.memory_space<vmem>>, vector<1x256xf32>,
      %cst_30 = arith.constant 0.000000e+00 : f32
      %50 = vector.broadcast %cst_30 : f32 to vector<4x1xf32>
      %c0_31 = arith.constant 0 : index
      %c0_32 = arith.constant 0 : index
      %51 = vector.load %arg12[%c0_31, %c0_32] : memref<4x1xf32, #tpu.memory_space<vmem>>, vector<4x1xf32>
      tpu.vector_store %arg12[%c0_31, %c0_32], %50 {strides = array<i32>} : memref<4x1xf32, #tpu.memory_space<vmem>>, vector<4x1xf32>,
      %cst_33 = arith.constant 0.000000e+00 : f32
      %52 = vector.broadcast %cst_33 : f32 to vector<4x1xf32>
      %c0_34 = arith.constant 0 : index
      %c0_35 = arith.constant 0 : index
      %53 = vector.load %arg13[%c0_34, %c0_35] : memref<4x1xf32, #tpu.memory_space<vmem>>, vector<4x1xf32>
      tpu.vector_store %arg13[%c0_34, %c0_35], %52 {strides = array<i32>} : memref<4x1xf32, #tpu.memory_space<vmem>>, vector<4x1xf32>,
    } else {
    }
    %c0 = arith.constant 0 : index
    %c0_1 = arith.constant 0 : index
    %c0_2 = arith.constant 0 : index
    %3 = vector.load %arg4[%c0, %c0_1, %c0_2] : memref<1x4x256xf32, #tpu.memory_space<vmem>>, vector<1x4x256xf32>
    %4 = vector.shape_cast %3 : vector<1x4x256xf32> to vector<4x256xf32>
    %c0_3 = arith.constant 0 : index
    %c0_4 = arith.constant 0 : index
    %c0_5 = arith.constant 0 : index
    %5 = vector.load %arg5[%c0_3, %c0_4, %c0_5] : memref<1x1x256xi8, #tpu.memory_space<vmem>>, vector<1x1x256xi8>
    %6 = vector.shape_cast %5 : vector<1x1x256xi8> to vector<1x256xi8>
    %7 = arith.extsi %6 : vector<1x256xi8> to vector<1x256xi32>
    %8 = tpu.iota {dimensions = array<i32: 0>} : vector<4x256xi32>
    %9 = vector.broadcast %7 : vector<1x256xi32> to vector<4x256xi32>
    %10 = arith.cmpi eq, %8, %9 : vector<4x256xi32>
    %cst = arith.constant dense<0xFF800000> : vector<256xf32>
    %11 = vector.multi_reduction <maximumf>, %4, %cst [0] : vector<4x256xf32> to vector<256xf32>
    %12 = vector.shape_cast %11 : vector<256xf32> to vector<1x256xf32>
    %13 = vector.broadcast %12 : vector<1x256xf32> to vector<4x256xf32>
    %14 = arith.subf %4, %13 : vector<4x256xf32>
    %15 = math.exp %14 : vector<4x256xf32>
    %cst_6 = arith.constant dense<0.000000e+00> : vector<256xf32>
    %16 = vector.multi_reduction <add>, %15, %cst_6 [0] : vector<4x256xf32> to vector<256xf32>
    %17 = vector.shape_cast %16 : vector<256xf32> to vector<1x256xf32>
    %18 = tpu.reciprocal %17 : vector<1x256xf32> -> vector<1x256xf32>
    %19 = math.log %17 : vector<1x256xf32>
    %cst_7 = arith.constant 0.000000e+00 : f32
    %20 = vector.broadcast %cst_7 : f32 to vector<4x256xf32>
    %21 = arith.select %10, %14, %20 : vector<4x256xi1>, vector<4x256xf32>
    %cst_8 = arith.constant dense<0.000000e+00> : vector<256xf32>
    %22 = vector.multi_reduction <add>, %21, %cst_8 [0] : vector<4x256xf32> to vector<256xf32>
    %23 = vector.shape_cast %22 : vector<256xf32> to vector<1x256xf32>
    %24 = arith.subf %19, %23 : vector<1x256xf32>
    %c0_9 = arith.constant 0 : index
    %c0_10 = arith.constant 0 : index
    %25 = vector.load %arg10[%c0_9, %c0_10] : memref<1x256xf32, #tpu.memory_space<vmem>>, vector<1x256xf32>
    %26 = arith.addf %25, %24 : vector<1x256xf32>
    %c0_11 = arith.constant 0 : index
    %c0_12 = arith.constant 0 : index
    %27 = vector.load %arg10[%c0_11, %c0_12] : memref<1x256xf32, #tpu.memory_space<vmem>>, vector<1x256xf32>
    tpu.vector_store %arg10[%c0_11, %c0_12], %26 {strides = array<i32>} : memref<1x256xf32, #tpu.memory_space<vmem>>, vector<1x256xf32>,
    %28 = vector.broadcast %18 : vector<1x256xf32> to vector<4x256xf32>
    %29 = arith.mulf %15, %28 : vector<4x256xf32>
    %c0_13 = arith.constant 0 : index
    %c0_14 = arith.constant 0 : index
    %30 = vector.load %arg12[%c0_13, %c0_14] : memref<4x1xf32, #tpu.memory_space<vmem>>, vector<4x1xf32>
    %cst_15 = arith.constant 0.000000e+00 : f32
    %31 = vector.broadcast %cst_15 : f32 to vector<4x256xf32>
    %32 = arith.select %10, %29, %31 : vector<4x256xi1>, vector<4x256xf32>
    %cst_16 = arith.constant dense<0.000000e+00> : vector<4xf32>
    %33 = vector.multi_reduction <add>, %32, %cst_16 [1] : vector<4x256xf32> to vector<4xf32>
    %34 = vector.shape_cast %33 : vector<4xf32> to vector<4x1xf32>
    %35 = arith.addf %30, %34 : vector<4x1xf32>
    %c0_17 = arith.constant 0 : index
    %c0_18 = arith.constant 0 : index
    %36 = vector.load %arg12[%c0_17, %c0_18] : memref<4x1xf32, #tpu.memory_space<vmem>>, vector<4x1xf32>
    tpu.vector_store %arg12[%c0_17, %c0_18], %35 {strides = array<i32>} : memref<4x1xf32, #tpu.memory_space<vmem>>, vector<4x1xf32>,
    %c0_19 = arith.constant 0 : index
    %c0_20 = arith.constant 0 : index
    %37 = vector.load %arg13[%c0_19, %c0_20] : memref<4x1xf32, #tpu.memory_space<vmem>>, vector<4x1xf32>
    %cst_21 = arith.constant 1.000000e+00 : f32
    %38 = vector.broadcast %cst_21 : f32 to vector<4x256xf32>
    %39 = arith.addf %29, %38 : vector<4x256xf32>
    %40 = arith.select %10, %39, %29 : vector<4x256xi1>, vector<4x256xf32>
    %cst_22 = arith.constant dense<0.000000e+00> : vector<4xf32>
    %41 = vector.multi_reduction <add>, %40, %cst_22 [1] : vector<4x256xf32> to vector<4xf32>
    %42 = vector.shape_cast %41 : vector<4xf32> to vector<4x1xf32>
    %43 = arith.addf %37, %42 : vector<4x1xf32>
    %c0_23 = arith.constant 0 : index
    %c0_24 = arith.constant 0 : index
    %44 = vector.load %arg13[%c0_23, %c0_24] : memref<4x1xf32, #tpu.memory_space<vmem>>, vector<4x1xf32>
    tpu.vector_store %arg13[%c0_23, %c0_24], %43 {strides = array<i32>} : memref<4x1xf32, #tpu.memory_space<vmem>>, vector<4x1xf32>,
    %c0_i32_25 = arith.constant 0 : i32
    %45 = arith.cmpi eq, %arg2, %c0_i32_25 : i32
    %46 = arith.extui %45 : i1 to i32
    %c0_i32_26 = arith.constant 0 : i32
    %47 = arith.cmpi ne, %46, %c0_i32_26 : i32
    scf.if %47 {
      %c0_27 = arith.constant 0 : index
      %c0_28 = arith.constant 0 : index
      %48 = vector.load %arg10[%c0_27, %c0_28] : memref<1x256xf32, #tpu.memory_space<vmem>>, vector<1x256xf32>
      %cst_29 = arith.constant dense<0.000000e+00> : vector<1xf32>
      %49 = vector.multi_reduction <add>, %48, %cst_29 [1] : vector<1x256xf32> to vector<1xf32>
      %50 = vector.shape_cast %49 : vector<1xf32> to vector<1x1xf32>
      %c0_30 = arith.constant 0 : index
      %c0_31 = arith.constant 0 : index
      %c0_32 = arith.constant 0 : index
      %c0_33 = arith.constant 0 : index
      %51 = vector.load %arg6[%c0_30, %c0_31, %c0_32, %c0_33] : memref<1x1x1x1xf32, #tpu.memory_space<vmem>>, vector<1x1x1x1xf32>
      %52 = vector.shape_cast %51 : vector<1x1x1x1xf32> to vector<1x1xf32>
      %53 = vector.shape_cast %50 : vector<1x1xf32> to vector<1x1x1x1xf32>
      tpu.vector_store %arg6[%c0_30, %c0_31, %c0_32, %c0_33], %53 {strides = array<i32>} : memref<1x1x1x1xf32, #tpu.memory_space<vmem>>, vector<1x1x1x1xf32>,
      %c0_34 = arith.constant 0 : index
      %c0_35 = arith.constant 0 : index
      %54 = vector.load %arg12[%c0_34, %c0_35] : memref<4x1xf32, #tpu.memory_space<vmem>>, vector<4x1xf32>
      %c0_36 = arith.constant 0 : index
      %c0_37 = arith.constant 0 : index
      %c0_38 = arith.constant 0 : index
      %c0_39 = arith.constant 0 : index
      %55 = vector.load %arg8[%c0_36, %c0_37, %c0_38, %c0_39] : memref<1x1x4x1xf32, #tpu.memory_space<vmem>>, vector<1x1x4x1xf32>
      %56 = vector.shape_cast %55 : vector<1x1x4x1xf32> to vector<4x1xf32>
      %57 = vector.shape_cast %54 : vector<4x1xf32> to vector<1x1x4x1xf32>
      tpu.vector_store %arg8[%c0_36, %c0_37, %c0_38, %c0_39], %57 {strides = array<i32>} : memref<1x1x4x1xf32, #tpu.memory_space<vmem>>, vector<1x1x4x1xf32>,
      %c0_40 = arith.constant 0 : index
      %c0_41 = arith.constant 0 : index
      %58 = vector.load %arg13[%c0_40, %c0_41] : memref<4x1xf32, #tpu.memory_space<vmem>>, vector<4x1xf32>
      %c0_42 = arith.constant 0 : index
      %c0_43 = arith.constant 0 : index
      %c0_44 = arith.constant 0 : index
      %c0_45 = arith.constant 0 : index
      %59 = vector.load %arg9[%c0_42, %c0_43, %c0_44, %c0_45] : memref<1x1x4x1xf32, #tpu.memory_space<vmem>>, vector<1x1x4x1xf32>
      %60 = vector.shape_cast %59 : vector<1x1x4x1xf32> to vector<4x1xf32>
      %61 = vector.shape_cast %58 : vector<4x1xf32> to vector<1x1x4x1xf32>
      tpu.vector_store %arg9[%c0_42, %c0_43, %c0_44, %c0_45], %61 {strides = array<i32>} : memref<1x1x4x1xf32, #tpu.memory_space<vmem>>, vector<1x1x4x1xf32>,
      %cst_46 = arith.constant 0.000000e+00 : f32
      %62 = vector.broadcast %cst_46 : f32 to vector<1x1xf32>
      %c0_47 = arith.constant 0 : index
      %c0_48 = arith.constant 0 : index
      %c0_49 = arith.constant 0 : index
      %c0_50 = arith.constant 0 : index
      %63 = vector.load %arg7[%c0_47, %c0_48, %c0_49, %c0_50] : memref<1x1x1x1xf32, #tpu.memory_space<vmem>>, vector<1x1x1x1xf32>
      %64 = vector.shape_cast %63 : vector<1x1x1x1xf32> to vector<1x1xf32>
      %65 = vector.shape_cast %62 : vector<1x1xf32> to vector<1x1x1x1xf32>
      tpu.vector_store %arg7[%c0_47, %c0_48, %c0_49, %c0_50], %65 {strides = array<i32>} : memref<1x1x1x1xf32, #tpu.memory_space<vmem>>, vector<1x1x1x1xf32>,
    } else {
    }
    return
  }
  func.func @transform_0(%arg0: i32, %arg1: i32, %arg2: i32) -> (i32, i32) {
    %c0_i32 = arith.constant 0 : i32
    %c0_i32_0 = arith.constant 0 : i32
    %c0_i32_1 = arith.constant 0 : i32
    return %c0_i32, %c0_i32_0 : i32, i32
  }
  func.func @transform_1(%arg0: i32, %arg1: i32, %arg2: i32) -> (i32, i32, i32) {
    %c1_i32 = arith.constant 1 : i32
    %0 = arith.muli %arg1, %c1_i32 : i32
    %1 = arith.addi %0, %arg2 : i32
    %c0_i32 = arith.constant 0 : i32
    %c0_i32_0 = arith.constant 0 : i32
    return %arg0, %c0_i32, %1 : i32, i32, i32
  }
  func.func @transform_2(%arg0: i32, %arg1: i32, %arg2: i32) -> (i32, i32, i32) {
    %c1_i32 = arith.constant 1 : i32
    %0 = arith.muli %arg1, %c1_i32 : i32
    %1 = arith.addi %0, %arg2 : i32
    %c0_i32 = arith.constant 0 : i32
    %c0_i32_0 = arith.constant 0 : i32
    return %arg0, %c0_i32, %1 : i32, i32, i32
  }
  func.func @transform_3(%arg0: i32, %arg1: i32, %arg2: i32) -> (i32, i32, i32, i32) {
    %c0_i32 = arith.constant 0 : i32
    %c0_i32_0 = arith.constant 0 : i32
    %c0_i32_1 = arith.constant 0 : i32
    return %arg0, %arg1, %c0_i32, %c0_i32_0 : i32, i32, i32, i32
  }
  func.func @transform_4(%arg0: i32, %arg1: i32, %arg2: i32) -> (i32, i32, i32, i32) {
    %c0_i32 = arith.constant 0 : i32
    %c0_i32_0 = arith.constant 0 : i32
    %c0_i32_1 = arith.constant 0 : i32
    return %arg0, %arg1, %c0_i32, %c0_i32_0 : i32, i32, i32, i32
  }
  func.func @transform_5(%arg0: i32, %arg1: i32, %arg2: i32) -> (i32, i32, i32, i32) {
    %c0_i32 = arith.constant 0 : i32
    %c0_i32_0 = arith.constant 0 : i32
    %c0_i32_1 = arith.constant 0 : i32
    return %arg0, %arg1, %c0_i32, %c0_i32_0 : i32, i32, i32, i32
  }
  func.func @transform_6(%arg0: i32, %arg1: i32, %arg2: i32) -> (i32, i32, i32, i32) {
    %c0_i32 = arith.constant 0 : i32
    %c0_i32_0 = arith.constant 0 : i32
    %c0_i32_1 = arith.constant 0 : i32
    return %arg0, %arg1, %c0_i32, %c0_i32_0 : i32, i32, i32, i32
  }
}

</mosaic_0001>

<bundles_post_ra>
// kernel: tpu_custom_call.1
= control target key start
LH: loop header
LB: loop body
LE: loop exit
PB: predicated region body
PF: predicated region fallthrough
CT: control target
= control target key end

     0   :  { %12 = vsyncpa [#allocation7], 0  ;;  %s1184_s0 = inlined_call_operand.vmem [shape: f32[4,1], index: 0, kind: input, shape index: {}]   ;;  %s1185_s1 = inlined_call_operand.hbm [shape: f32[2,4,256], index: 1, kind: input, shape index: {}]   ;;  %s1186_s2 = inlined_call_operand.vmem [shape: s8[2,1,256], index: 2, kind: input, shape index: {}]   ;;  %s1187_s3 = inlined_call_operand.vmem [shape: f32[2,1,1,1], index: 3, kind: output, shape index: {0}]   ;;  %s1188_s4 = inlined_call_operand.vmem [shape: f32[2,1,1,1], index: 4, kind: output, shape index: {1}]   ;;  %s1189_s5 = inlined_call_operand.vmem [shape: f32[2,1,4,1], index: 5, kind: output, shape index: {2}]   ;;  %s1190_s6 = inlined_call_operand.vmem [shape: f32[2,1,4,1], index: 6, kind: output, shape index: {3}]  }
   0x1   :  { %14 = vsyncpa [#allocation7 + $0x1], 0  ;;  %s1002_s0 = smov 0   ;;  %s1004_s21 = smov 0  }
   0x2   :  { %s1006_s22 = smov 0   ;;  %s1008_s23 = smov 0  }
   0x3   :  { %s1010_s24 = smov 0   ;;  %s1012_s25 = smov 0  }
   0x4 LB: > { %s801_s26 = sadd.s32 4294967295, %s962_s25   ;;  %s39_s27 = sadd.s32 1, %s958_s24  ;;  %s962_s25 = sphi %s1012_s25, %s20_s25   ;;  %s958_s24 = sphi %s1010_s24, %s1204_s24   ;;  %s954_s23 = sphi %s1008_s23, %s1203_s23   ;;  %s950_s22 = sphi %s1006_s22, %s1202_s22   ;;  %s946_s21 = sphi %s1004_s21, %s1201_s21   ;;  %s942_s0 = sphi %s1002_s0, %s1200_s0  }
   0x5   : > { %p41_p0 = scmp.ge.s32.totalorder %s39_s27, 2  ;;  %s71_s28 = sadd.s32 1, %s950_s22 }
   0x6   : > { %p78_p1 = scmp.ne.s32.totalorder %s950_s22, %s946_s21  ;;  %p79_p2 = scmp.eq.s32.totalorder %s962_s25, 0 }
   0x7   : > { %s1206_s27 = smov (%p41_p0, %s39_s27), 0  ;;  %p84_p4 = scmp.ne.s32.totalorder %s946_s21, %s942_s0 }
   0x8   : > { %p1038_p3 = por %p79_p2, %p78_p1  ;;  %s66_s30 = ssub.s32 %s958_s24, %s1206_s27 }
   0x9   : > { %p85_p5 = scmp.eq.s32.totalorder %s801_s26, 0  ;;  %p69_p6 = scmp.eq.s32.totalorder %s66_s30, 0 }
   0xa   : > { %p822_p8 = scmp.lt.s32.totalorder %s962_s25, 2  ;;  %s253_s9 = sand.u32 1, %s950_s22  }
   0xb   : > { %p1045_p7 = por %p85_p5, %p84_p4  ;;  %s815_s10 = sshll.u32 %s958_s24, 7 }
   0xc   : > { %s1051_s8 = scalar_select %p69_p6, %s950_s22, %s71_s28  }
   0xd   : > { %s805_s11 = sshll.u32 %s253_s9, 3  ;;  %s266_s14 = scalar_lea.hbm %s1185_s1, %s815_s10 }
   0xe   : > { %s257_s15 = scalar_lea.vmem [#allocation6], %s805_s11  ;;  %p1060_p9 = pnand %p822_p8, %p1038_p3 }
   0xf   : > { %s268_s16 = sshll.u32 %s257_s15, 4  ;;  %p808_p10 = scmp.ge.s32.totalorder %s962_s25, 1  ;;  %s269_s16 = int_to_ptr.vmem [resolvable:$true] %s268_s16 }
  0x10   : > { %p287_p11 = scmp.lt.s32.totalorder %s962_s25, 3  ;;  %s254_s18 = scalar_lea.sflag [#allocation7], %s253_s9 }
  0x11   : > { %p886_p12 = pneg %p1060_p9  ;;  %s897_s19 = scalar_lea.vmem %s269_s16, 128 }
  0x12   : > { %p898_p13 = scmp.ne.s32.totalorder %s269_s16, %s897_s19  ;;  %s964_s20 = smov [#allocation6]  }
  0x13   : > { %s902_s0 = sshll.u32 %s964_s20, 4  ;;  %s903_s0 = int_to_ptr.vmem [resolvable:$false] %s902_s0 }
  0x14   : > { %p900_p0 = pnand %p898_p13, %p886_p12  ;;  %s904_s26 = scalar_lea.vmem %s903_s0, 256 }
  0x15   : > { %p905_p2 = scmp.lt.s32.totalorder %s269_s16, %s903_s0  ;;  %p906_p3 = scmp.lt.s32.totalorder %s904_s26, %s897_s19 }
  0x16   : > { %p901_p1 = pneg %p900_p0 }
  0x17   : > { %p907_p4 = por %p906_p3, %p905_p2 }
  0x19   : > { %p908_p5 = pnand %p907_p4, %p901_p1 }
  0x1b   : > { %911 = shalt.err (!%p908_p5)
}
  0x1c   : > { %821 = dma.hbm_to_vmem [thread:$0]  (!%p1060_p9), %s266_s14, 128, %s269_s16, %s254_s18  }
  0x1d   : > { %p288_p6 = pnand %p808_p10, %p287_p11 }
  0x1e   : > { %s293_s28 = sand.u32 (!%p288_p6), 1, %s946_s21  }
  0x1f   : > { %291 = sbr.rel (%p288_p6) target bundleno = 267 (0x10b), region = 32  ;;  %s809_s29 = sshll.u32 (!%p288_p6), %s293_s28, 3 }
  0x20   : > { %s294_s30 = scalar_lea.sflag (!%p288_p6), [#allocation7], %s293_s28  ;;  %s297_s9 = scalar_lea.vmem (!%p288_p6), [#allocation6], %s809_s29 }
  0x24   : > { %937 = dma.done.wait (%p1045_p7), %s294_s30, 128  }
  0x25   : > { %939 = vsyncadd (%p1045_p7), %s294_s30, 4294967168  ;;  %v399_v0 = vlaneseq  ;;  %vm404_vm0 = vcmask 3072   ;;  %v965_v2 = vmov 0.0   ;;  %vm433_vm2 = vcmask 1043456   ;;  %v407_v3 = vld [vmem:[%s297_s9] sm:$0xff]  ;;  %p360_p7 = scmp.lt.s32.totalorder %s954_s23, 1 }
  0x26   : > { %405 = vst.msk [vmem:[#allocation4] sm:$0xf] %vm404_vm0, %v965_v2  ;;  %406 = vst.msk [vmem:[#allocation5] sm:$0xf] %vm404_vm0, %v965_v2  ;;  %v431_v4 = vcombine.high %v407_v3, %v407_v3  ;;  %v434_v5 = vsel %vm433_vm2, %v407_v3, -inf  ;;  %vm572_vm5 = vcmask 1040384  }
  0x27   : > { %vm1079_vm1 = vcmp.lt.s32.totalorder %v399_v0, 256  ;;  %v435_v6 = vrot.slane %v434_v5, 4  ;;  %s1208_s23 = smov (!%p360_p7, %s954_s23), 1  ;;  %v1100_v20 = vshrl.u32 %v399_v0, 7  ;;  %v966_v0 = vmov 1966171168  }
  0x28   : > { %403 = vst.msk [vmem:[#allocation2] sm:$0x3] %vm1079_vm1, %v965_v2  ;;  %v441_v7 = vsel %vm433_vm2, %v431_v4, -inf  ;;  %s810_s7 = sshll.u32 %s1208_s23, 1  ;;  %s380_s15 = scalar_lea.vmem %s1188_s4, %s1208_s23  ;;  %vm578_vm6 = vcmask 0  }
  0x29   : > { %v436_v8 = vmax.f32 %v434_v5, %v435_v6  ;;  %v442_v9 = vrot.slane %v441_v7, 4  ;;  %s366_s12 = scalar_lea.vmem %s1186_s2, %s810_s7  ;;  %v1103_v25 = vsub.s32 0, %v1100_v20  ;;  %v418_v26 = vsub.s32 4, %v1100_v20  ;;  %584 = vst.msk [vmem:[%s380_s15] sm:$0x1] %vm578_vm6, %v965_v2  ;;  %s811_s16 = sshll.u32 %s1208_s23, 2 }
  0x2a   : > { %v408_v21 = vld [vmem:[%s366_s12] sm:$0x3]  ;;  %v568_v31 = vsub.s32 1, %v1100_v20  ;;  %s387_s19 = scalar_lea.vmem %s1189_s5, %s811_s16  ;;  %s394_s26 = scalar_lea.vmem %s1190_s6, %s811_s16 }
  0x2b   : > { %v437_v10 = vrot.slane %v436_v8, 2  ;;  %v443_v11 = vmax.f32 %v441_v7, %v442_v9  ;;  %v409_v24 = vunpack.c.0.s8 %v408_v21  ;;  %s374_s30 = scalar_lea.vmem %s1187_s3, %s1208_s23 }
  0x2d   : > { %v438_v12 = vmax.f32 %v436_v8, %v437_v10  ;;  %v444_v13 = vrot.slane %v443_v11, 2  ;;  %v415_v27 = vrot.slane %v409_v24, %v1103_v25  ;;  %v419_v28 = vrot.slane %v409_v24, %v418_v26  ;;  %v529_v1 = vld [vmem:[#allocation4] sm:$0xf] }
  0x2f   : > { %v439_v14 = vrot.slane %v438_v12, 1  ;;  %v445_v15 = vmax.f32 %v443_v11, %v444_v13  ;;  %v423_v29 = vrot.slane %v415_v27, %v1103_v25  ;;  %v427_v30 = vrot.slane %v419_v28, %v1103_v25 }
  0x31   : > { %v440_v16 = vmax.f32 %v438_v12, %v439_v14  ;;  %v446_v17 = vrot.slane %v445_v15, 1  ;;  %vm1110_vm3 = vcmp.eq.s32.totalorder %v1100_v20, %v423_v29  ;;  %vm1115_vm4 = vcmp.eq.s32.totalorder %v1100_v20, %v427_v30 }
  0x33   : > { %v447_v18 = vmax.f32 %v445_v15, %v446_v17 }
  0x35   : > { %v450_v19 = vcombine.low %v440_v16, %v447_v18 }
  0x37   : > { %v452_v22 = vsub.f32 %v407_v3, %v450_v19  ;;  %v504_v3 = vunpack.c.l.s4 %v966_v0 }
  0x39   : > { %v453_v23 = vmul.f32 1.442695, %v452_v22  ;;  %v479_v32 = vcombine.high %v452_v22, %v452_v22  ;;  %v481_v37 = vsel %vm1110_vm3, %v452_v22, 0.0  ;;  %v505_v10 = vunpack.c.0.s8 %v504_v3 }
  0x3a   : > { %v483_v43 = vsel %vm433_vm2, %v481_v37, 0.0 }
  0x3b   : > { %874 = vpow2.f32 %v453_v23  ;;  %v482_v40 = vsel %vm1115_vm4, %v479_v32, 0.0  ;;  %v484_v47 = vrot.slane %v483_v43, 4  ;;  %v508_v17 = vsub.s32 %v505_v10, %v1100_v20 }
  0x3c   : > { %v490_v46 = vsel %vm433_vm2, %v482_v40, 0.0 }
  0x3d   : > { %v491_v50 = vrot.slane %v490_v46, 4  ;;  %v485_v53 = vadd.f32 %v484_v47, %v483_v43 }
  0x3f   : > { %v492_v56 = vadd.f32 %v491_v50, %v490_v46  ;;  %v486_v58 = vrot.slane %v485_v53, 2  ;;  %v543_v46 = vld [vmem:[#allocation5] sm:$0xf] }
  0x41   : > { %v493_v59 = vrot.slane %v492_v56, 2  ;;  %v487_v60 = vadd.f32 %v486_v58, %v485_v53 }
  0x43   : > { %v494_v61 = vadd.f32 %v493_v59, %v492_v56  ;;  %v488_v62 = vrot.slane %v487_v60, 1 }
  0x45   : > { %v495_v63 = vrot.slane %v494_v61, 1  ;;  %v489_v5 = vadd.f32 %v488_v62, %v487_v60 }
  0x47   : > { %v496_v9 = vadd.f32 %v495_v63, %v494_v61 }
  0x48   : > { %v875_v33 = vpop.eup %874 }
  0x49   : > { %v456_v35 = vcombine.high %v875_v33, %v875_v33  ;;  %v458_v36 = vsel %vm433_vm2, %v875_v33, 0.0 }
  0x4a   : > { %v459_v38 = vrot.slane %v458_v36, 4 }
  0x4b   : > { %v465_v39 = vsel %vm433_vm2, %v456_v35, 0.0 }
  0x4c   : > { %v460_v41 = vadd.f32 %v459_v38, %v458_v36  ;;  %v466_v42 = vrot.slane %v465_v39, 4 }
  0x4e   : > { %v461_v44 = vrot.slane %v460_v41, 2  ;;  %v467_v45 = vadd.f32 %v466_v42, %v465_v39 }
  0x50   : > { %v462_v48 = vadd.f32 %v461_v44, %v460_v41  ;;  %v468_v49 = vrot.slane %v467_v45, 2 }
  0x52   : > { %v463_v51 = vrot.slane %v462_v48, 1  ;;  %v469_v52 = vadd.f32 %v468_v49, %v467_v45 }
  0x54   : > { %v464_v54 = vadd.f32 %v463_v51, %v462_v48  ;;  %v470_v55 = vrot.slane %v469_v52, 1 }
  0x56   : > { %v471_v57 = vadd.f32 %v470_v55, %v469_v52  ;;  %876 = vrcp.f32 %v464_v54 }
  0x57   : > { %878 = vlog2.f32 %v464_v54 }
  0x58   : > { %880 = vrcp.f32 %v471_v57 }
  0x59   : > { %882 = vlog2.f32 %v471_v57 }
  0x63   : > { %v877_v4 = vpop.eup %876 }
  0x64   : > { %v879_v6 = vpop.eup %878 }
  0x65   : > { %v881_v7 = vpop.eup %880  ;;  %v475_v8 = vmul.f32 0.6931472, %v879_v6 }
  0x66   : > { %v883_v11 = vpop.eup %882  ;;  %v526_v12 = vcombine.low %v877_v4, %v881_v7 }
  0x67   : > { %v477_v13 = vmul.f32 0.6931472, %v883_v11  ;;  %v497_v14 = vsub.f32 %v475_v8, %v489_v5 }
  0x68   : > { %v528_v15 = vmul.f32 %v875_v33, %v526_v12  ;;  %v499_v33 = vld [vmem:[#allocation2] sm:$0x3] }
  0x69   : > { %v498_v16 = vsub.f32 %v477_v13, %v496_v9 }
  0x6a   : > { %v531_v18 = vcombine.high %v528_v15, %v528_v15  ;;  %v533_v19 = vsel %vm1110_vm3, %v528_v15, 0.0  ;;  %v544_v21 = vadd.f32 1.0, %v528_v15 }
  0x6b   : > { %v502_v22 = vcombine.low %v497_v14, %v498_v16  ;;  %v535_v23 = vsel %vm433_vm2, %v533_v19, 0.0 }
  0x6c   : > { %v534_v24 = vsel %vm1115_vm4, %v531_v18, 0.0  ;;  %v546_v26 = vcombine.high %v544_v21, %v544_v21  ;;  %v548_v27 = vsel %vm1110_vm3, %v544_v21, %v528_v15 }
  0x6d   : > { %v509_v28 = vrot.slane %v502_v22, %v508_v17  ;;  %v536_v29 = vsel %vm433_vm2, %v534_v24, 0.0  ;;  %v550_v30 = vsel %vm433_vm2, %v548_v27, 0.0 }
  0x6e   : > { %v537_v32 = vadd.f32 %v536_v29, %v535_v23  ;;  %v549_v35 = vsel %vm1115_vm4, %v546_v26, %v531_v18 }
  0x6f   : > { %v516_v36 = vrot.slane %v509_v28, %v508_v17  ;;  %v551_v37 = vsel %vm433_vm2, %v549_v35, 0.0 }
  0x70   : > { %538 = vadd.xlane.f32.xlu0 %v537_v32  ;;  %v552_v38 = vadd.f32 %v551_v37, %v550_v30 }
  0x71   : > { %v518_v39 = vadd.f32 %v516_v36, %v499_v33 }
  0x73   : > { %523 = vst.msk [vmem:[#allocation2] sm:$0x3] %vm1079_vm1, %v518_v39 }
  0x74   : > { %553 = vadd.xlane.f32.xlu0 %v552_v38 }
  0x7a   : > { %v560_v40 = vld [vmem:[#allocation2] sm:$0x3] }
  0x7b   : > { %v565_v41 = vrot.slane %v560_v40, %v1103_v25  ;;  %v569_v34 = vrot.slane %v560_v40, %v568_v31 }
  0x7d   : > { %v573_v42 = vsel %vm572_vm5, %v565_v41, 0.0  ;;  %v574_v43 = vsel %vm572_vm5, %v569_v34, 0.0 }
  0x7e   : > { %v575_v44 = vadd.f32 %v574_v43, %v573_v42 }
  0x80   : > { %576 = vadd.xlane.f32.xlu1 %v575_v44 }
  0xf9   : > { %v539_v20 = vpop.xlane.xlu0 %538 }
  0xfa   : > { %v540_v45 = vadd.f32 %v539_v20, %v529_v1 }
  0xfc   : > { %542 = vst.msk [vmem:[#allocation4] sm:$0xf] %vm404_vm0, %v540_v45 }
  0xfd   : > { %v554_v25 = vpop.xlane.xlu0 %553 }
  0xfe   : > { %v555_v47 = vadd.f32 %v554_v25, %v543_v46 }
 0x100   : > { %556 = vst.msk [vmem:[#allocation5] sm:$0xf] %vm404_vm0, %v555_v47 }
 0x103   : > { %v580_v48 = vld [vmem:[#allocation4] sm:$0xf] }
 0x104   : > { %581 = vst.msk [vmem:[%s387_s19] sm:$0xf] %vm404_vm0, %v580_v48 }
 0x107   : > { %v582_v2 = vld [vmem:[#allocation5] sm:$0xf] }
 0x108   : > { %583 = vst.msk [vmem:[%s394_s26] sm:$0xf] %vm404_vm0, %v582_v2 }
 0x109   : > { %v577_v49 = vpop.xlane.xlu1 %576 }
 0x10a   : > { %579 = vst.msk [vmem:[%s374_s30] sm:$0x1] %vm578_vm6, %v577_v49 }
 0x10b PF: > { %s20_s25 = sadd.s32 1, %s962_s25   ;;  %s1200_s0 = smov %s946_s21 }
 0x10c   : > { %p17_p8 = scmp.ge.s32.totalorder %s20_s25, 4   ;;  %s1201_s21 = smov %s950_s22 }
 0x10d   : > { %s1202_s22 = smov %s1051_s8  ;;  %s1203_s23 = smov %s958_s24 }
 0x10e   : > { %s1204_s24 = smov %s1206_s27  ;;  %19 = sbr.rel (!%p17_p8) target bundleno = 4 (0x4), region = 119 }
 0x113   :  { %666 = vsyncpa [#allocation7], 1 }
 0x114   :  { %668 = vsyncpa [#allocation7 + $0x1], 1 }

</bundles_post_ra>
